<compile_context>
chip_gen: v7x
topology: tpu7x:2x2x1
jax: 0.10.0
libtpu: 0.0.40
codegen_flags: <defaults>
</compile_context>

<pallas_src>
import functools

import jax
import jax.numpy as jnp
from jax.experimental import pallas as pl
from jax.experimental.pallas import tpu as pltpu

LOG_SIG_MAX = 2.0
LOG_SIG_MIN = -20.0
EPSILON = 1e-6
LOG_2PI = 1.8378770664093453  # log(2*pi)


def _round_up(x, m):
    return (x + m - 1) // m * m


# --------------------------------------------------------------------------
# Kernels
# --------------------------------------------------------------------------
def _mlp_trunk(state_ref, w1_ref, b1_ref, w2_ref, b2_ref, wh_ref, bh_ref):
    """Shared fc1+relu -> fc2+relu -> fused (mean|log_std) head. f32 out."""
    x = state_ref[...]
    h1 = jnp.dot(x.astype(w1_ref.dtype), w1_ref[...],
                 preferred_element_type=jnp.float32) + b1_ref[...]
    h1 = jnp.maximum(h1, 0.0)

    h2 = jnp.dot(h1.astype(w2_ref.dtype), w2_ref[...],
                 preferred_element_type=jnp.float32) + b2_ref[...]
    h2 = jnp.maximum(h2, 0.0)

    heads = jnp.dot(h2.astype(wh_ref.dtype), wh_ref[...],
                    preferred_element_type=jnp.float32) + bh_ref[...]
    return heads  # (TB, 2A) = [mean | log_std(unclipped)]


def _policy_forward_kernel(
    state_ref,                    # (TB, S)  f32
    w1_ref, b1_ref,               # (S, H) bf16, (1, H) f32
    w2_ref, b2_ref,               # (H, H) bf16, (1, H) f32
    wh_ref, bh_ref,               # (H, 2A) bf16, (1, 2A) f32
    out_ref,                      # (TB, 2A) f32  -> mean | clipped log_std
    *, action_dim,
):
    heads = _mlp_trunk(state_ref, w1_ref, b1_ref, w2_ref, b2_ref, wh_ref, bh_ref)
    # Clip only the log_std half; lane-local select (no sub-vreg slicing).
    col = jax.lax.broadcasted_iota(jnp.int32, heads.shape, 1)
    clipped = jnp.clip(heads, LOG_SIG_MIN, LOG_SIG_MAX)
    out_ref[...] = jnp.where(col >= action_dim, clipped, heads).astype(out_ref.dtype)


def _policy_sample_kernel(
    state_ref, noise_ref,         # (TB, S) f32, (TB, A) f32
    w1_ref, b1_ref,
    w2_ref, b2_ref,
    wh_ref, bh_ref,
    pack_ref,                     # (TB, 4A) f32 -> action | z | mean | log_std
    logp_ref,                     # (TB, 1)  f32
    *, action_dim, max_action,
):
    heads = _mlp_trunk(state_ref, w1_ref, b1_ref, w2_ref, b2_ref, wh_ref, bh_ref)

    mean = heads[:, :action_dim]
    log_std = jnp.clip(heads[:, action_dim:], LOG_SIG_MIN, LOG_SIG_MAX)

    noise = noise_ref[...]
    std = jnp.exp(log_std)                     # EUP
    z = mean + std * noise
    action_t = jnp.tanh(z)                     # EUP

    # Normal(mean, std).log_prob(z) with z = mean + std*noise:
    #   -0.5*noise^2 - log_std - 0.5*log(2*pi), then tanh correction.
    log_prob = (-0.5 * noise * noise - log_std - 0.5 * LOG_2PI
                - jnp.log(1.0 - action_t * action_t + EPSILON))
    logp_ref[...] = jnp.sum(log_prob, axis=-1, keepdims=True).astype(logp_ref.dtype)

    packed = jnp.concatenate(
        [action_t * max_action, z, mean, log_std], axis=-1)
    pack_ref[...] = packed.astype(pack_ref.dtype)


# --------------------------------------------------------------------------
# Wrappers
# --------------------------------------------------------------------------
def _batch_tiling(B, block_b):
    """Pad batch to a sublane-friendly size and pick the batch tile."""
    B_pad = _round_up(max(B, 8), 8)
    tb = _round_up(min(block_b, B_pad), 8)
    B_pad = _round_up(B_pad, tb)
    return B_pad, tb


def _weight_specs(params):
    # Weights / biases: same block for every grid step -> stay VMEM resident.
    return [
        pl.BlockSpec(params["w1"].shape, lambda i: (0, 0)),
        pl.BlockSpec(params["b1"].shape, lambda i: (0, 0)),
        pl.BlockSpec(params["w2"].shape, lambda i: (0, 0)),
        pl.BlockSpec(params["b2"].shape, lambda i: (0, 0)),
        pl.BlockSpec(params["wh"].shape, lambda i: (0, 0)),
        pl.BlockSpec(params["bh"].shape, lambda i: (0, 0)),
    ]


def _forward_cost(B, S, H, A2):
    flops = 2 * B * (S * H + H * H + H * A2)
    bytes_accessed = 4 * B * (S + A2) + 2 * (S * H + H * H + H * A2) + 4 * (2 * H + A2)
    return pl.CostEstimate(flops=flops, transcendentals=0,
                           bytes_accessed=bytes_accessed)


def gaussian_policy_forward(state, params, *, block_b=256):
    """Pallas GaussianPolicy.forward -> (mean, log_std)."""
    B, S = state.shape
    H = params["w1"].shape[1]
    A2 = params["wh"].shape[1]
    A = A2 // 2

    B_pad, tb = _batch_tiling(B, block_b)
    if B_pad != B:
        state = jnp.pad(state, ((0, B_pad - B), (0, 0)))

    out = pl.pallas_call(
        functools.partial(_policy_forward_kernel, action_dim=A),
        out_shape=jax.ShapeDtypeStruct((B_pad, A2), jnp.float32),
        grid=(B_pad // tb,),
        in_specs=[pl.BlockSpec((tb, S), lambda i: (i, 0))] + _weight_specs(params),
        out_specs=pl.BlockSpec((tb, A2), lambda i: (i, 0)),
        compiler_params=pltpu.CompilerParams(dimension_semantics=("parallel",)),
        cost_estimate=_forward_cost(B_pad, S, H, A2),
    )(state, params["w1"], params["b1"], params["w2"], params["b2"],
      params["wh"], params["bh"])

    mean = out[:B, :A]
    log_std = out[:B, A:]
    return mean, log_std


def gaussian_policy_sample(state, noise, params, max_action, *, block_b=256):
    """Fused sample(): returns (action, log_prob, z, mean, log_std).

    Gaussian noise (standard normal, shape (B, A)) is drawn by the caller with
    jax.random and passed in (matches Normal.rsample reparameterization).
    """
    B, S = state.shape
    A2 = params["wh"].shape[1]
    A = A2 // 2

    B_pad, tb = _batch_tiling(B, block_b)
    if B_pad != B:
        state = jnp.pad(state, ((0, B_pad - B), (0, 0)))
        noise = jnp.pad(noise, ((0, B_pad - B), (0, 0)))

    packed, log_prob = pl.pallas_call(
        functools.partial(_policy_sample_kernel, action_dim=A,
                          max_action=float(max_action)),
        out_shape=(
            jax.ShapeDtypeStruct((B_pad, 4 * A), jnp.float32),
            jax.ShapeDtypeStruct((B_pad, 1), jnp.float32),
        ),
        grid=(B_pad // tb,),
        in_specs=[pl.BlockSpec((tb, S), lambda i: (i, 0)),
                  pl.BlockSpec((tb, A), lambda i: (i, 0))] + _weight_specs(params),
        out_specs=(pl.BlockSpec((tb, 4 * A), lambda i: (i, 0)),
                   pl.BlockSpec((tb, 1), lambda i: (i, 0))),
        compiler_params=pltpu.CompilerParams(dimension_semantics=("parallel",)),
    )(state, noise, params["w1"], params["b1"], params["w2"], params["b2"],
      params["wh"], params["bh"])

    action = packed[:B, 0 * A:1 * A]
    z = packed[:B, 1 * A:2 * A]
    mean = packed[:B, 2 * A:3 * A]
    log_std = packed[:B, 3 * A:4 * A]
    return action, log_prob[:B], z, mean, log_std


# --------------------------------------------------------------------------
# Parameters & references
# --------------------------------------------------------------------------
def init_params(key, state_dim, action_dim, hidden_dim):
    """PyTorch-Linear-like init; head weights fused to (H, 2A); bf16 MXU operands."""
    ks = jax.random.split(key, 8)

    def linear(kw, kb, fan_in, fan_out):
        bound = 1.0 / jnp.sqrt(fan_in)
        w = jax.random.uniform(kw, (fan_in, fan_out), jnp.float32, -bound, bound)
        b = jax.random.uniform(kb, (1, fan_out), jnp.float32, -bound, bound)
        return w, b

    w1, b1 = linear(ks[0], ks[1], state_dim, hidden_dim)
    w2, b2 = linear(ks[2], ks[3], hidden_dim, hidden_dim)
    wm, bm = linear(ks[4], ks[5], hidden_dim, action_dim)
    wl, bl = linear(ks[6], ks[7], hidden_dim, action_dim)

    wh = jnp.concatenate([wm, wl], axis=1)   # (H, 2A) = mean | log_std
    bh = jnp.concatenate([bm, bl], axis=1)   # (1, 2A)

    return dict(
        w1=w1.astype(jnp.bfloat16), b1=b1,
        w2=w2.astype(jnp.bfloat16), b2=b2,
        wh=wh.astype(jnp.bfloat16), bh=bh,
    )


def reference_forward(state, params):
    """Plain-JAX reference with the same bf16-operand / f32-accumulate math."""
    def dot(x, w):
        return jnp.dot(x.astype(w.dtype), w, preferred_element_type=jnp.float32)

    h1 = jnp.maximum(dot(state, params["w1"]) + params["b1"], 0.0)
    h2 = jnp.maximum(dot(h1, params["w2"]) + params["b2"], 0.0)
    heads = dot(h2, params["wh"]) + params["bh"]
    A = params["wh"].shape[1] // 2
    mean = heads[:, :A]
    log_std = jnp.clip(heads[:, A:], LOG_SIG_MIN, LOG_SIG_MAX)
    return mean, log_std


def reference_sample(state, noise, params, max_action):
    mean, log_std = reference_forward(state, params)
    std = jnp.exp(log_std)
    z = mean + std * noise
    action_t = jnp.tanh(z)
    log_prob = (-0.5 * noise * noise - log_std - 0.5 * LOG_2PI
                - jnp.log(1.0 - action_t * action_t + EPSILON))
    log_prob = jnp.sum(log_prob, axis=1, keepdims=True)
    return action_t * max_action, log_prob, z, mean, log_std


# --------------------------------------------------------------------------
# Test
# --------------------------------------------------------------------------
if __name__ == "__main__":
    B, S, A, H = 8, 16, 4, 32
    MAX_ACTION = 2.0

    key = jax.random.PRNGKey(0)
    k_state, k_params, k_noise = jax.random.split(key, 3)

    state = jax.random.normal(k_state, (B, S), jnp.float32)
    noise = jax.random.normal(k_noise, (B, A), jnp.float32)
    params = init_params(k_params, S, A, H)

    # forward()
    mean, log_std = gaussian_policy_forward(state, params)
    jax.block_until_ready((mean, log_std))
    mean_ref, log_std_ref = reference_forward(state, params)
    assert mean.shape == (B, A) and log_std.shape == (B, A)
    assert jnp.allclose(mean, mean_ref, atol=5e-3, rtol=5e-3)
    assert jnp.allclose(log_std, log_std_ref, atol=5e-3, rtol=5e-3)

    # sample()  (noise drawn outside; reparameterized rsample semantics)
    action, log_prob, z, mean_s, log_std_s = gaussian_policy_sample(
        state, noise, params, MAX_ACTION)
    jax.block_until_ready((action, log_prob, z, mean_s, log_std_s))
    a_ref, lp_ref, z_ref, m_ref2, ls_ref2 = reference_sample(
        state, noise, params, MAX_ACTION)
    assert action.shape == (B, A) and log_prob.shape == (B, 1)
    assert jnp.allclose(action, a_ref, atol=5e-3, rtol=5e-3)
    assert jnp.allclose(z, z_ref, atol=5e-3, rtol=5e-3)
    assert jnp.allclose(mean_s, m_ref2, atol=5e-3, rtol=5e-3)
    assert jnp.allclose(log_std_s, ls_ref2, atol=5e-3, rtol=5e-3)
    assert jnp.allclose(log_prob, lp_ref, atol=2e-2, rtol=2e-2)

    # get_action() is just tanh(mean) * max_action on the forward output; it
    # reuses the forward kernel, no extra Pallas work needed.
    eval_action = jnp.tanh(mean) * MAX_ACTION
    jax.block_until_ready(eval_action)

    print("KERNEL_OK")
</pallas_src>

<mosaic_0001>
module attributes {stable_mosaic.version = 11 : i64} {
  func.func @_policy_forward_kernel(%arg0: i32, %arg1: memref<8x16xf32, #tpu.memory_space<vmem>>, %arg2: memref<16x32xbf16, #tpu.memory_space<vmem>>, %arg3: memref<1x32xf32, #tpu.memory_space<vmem>>, %arg4: memref<32x32xbf16, #tpu.memory_space<vmem>>, %arg5: memref<1x32xf32, #tpu.memory_space<vmem>>, %arg6: memref<32x8xbf16, #tpu.memory_space<vmem>>, %arg7: memref<1x8xf32, #tpu.memory_space<vmem>>, %arg8: memref<8x8xf32, #tpu.memory_space<vmem>>) attributes {dimension_semantics = [#tpu.dimension_semantics<parallel>], iteration_bounds = array<i64: 1>, scalar_prefetch = 0 : i64, scratch_operands = 0 : i64, tpu.core_type = #tpu.core_type<tc>, window_params = [{transform_indices = @transform_0, window_bounds = array<i64: 8, 16>}, {pipeline_mode = #tpu.pipeline_mode<synchronous>, transform_indices = @transform_1, window_bounds = array<i64: 16, 32>}, {pipeline_mode = #tpu.pipeline_mode<synchronous>, transform_indices = @transform_2, window_bounds = array<i64: 1, 32>}, {pipeline_mode = #tpu.pipeline_mode<synchronous>, transform_indices = @transform_3, window_bounds = array<i64: 32, 32>}, {pipeline_mode = #tpu.pipeline_mode<synchronous>, transform_indices = @transform_4, window_bounds = array<i64: 1, 32>}, {pipeline_mode = #tpu.pipeline_mode<synchronous>, transform_indices = @transform_5, window_bounds = array<i64: 32, 8>}, {pipeline_mode = #tpu.pipeline_mode<synchronous>, transform_indices = @transform_6, window_bounds = array<i64: 1, 8>}, {transform_indices = @transform_7, window_bounds = array<i64: 8, 8>}]} {
    %c0 = arith.constant 0 : index
    %c0_0 = arith.constant 0 : index
    %0 = vector.load %arg1[%c0, %c0_0] : memref<8x16xf32, #tpu.memory_space<vmem>>, vector<8x16xf32>
    %1 = arith.truncf %0 : vector<8x16xf32> to vector<8x16xbf16>
    %c0_1 = arith.constant 0 : index
    %c0_2 = arith.constant 0 : index
    %2 = vector.load %arg2[%c0_1, %c0_2] : memref<16x32xbf16, #tpu.memory_space<vmem>>, vector<16x32xbf16>
    %cst = arith.constant dense<0.000000e+00> : vector<8x32xf32>
    %3 = tpu.matmul %1, %2, %cst {dimension_numbers = #tpu.dot_dimension_numbers<[1], [0], [0], [1], [0, 0, 1, 1], [], []>} : vector<8x16xbf16>, vector<16x32xbf16>, vector<8x32xf32> -> vector<8x32xf32>
    %c0_3 = arith.constant 0 : index
    %c0_4 = arith.constant 0 : index
    %4 = vector.load %arg3[%c0_3, %c0_4] : memref<1x32xf32, #tpu.memory_space<vmem>>, vector<1x32xf32>
    %5 = vector.broadcast %4 : vector<1x32xf32> to vector<8x32xf32>
    %6 = arith.addf %3, %5 : vector<8x32xf32>
    %cst_5 = arith.constant 0.000000e+00 : f32
    %7 = vector.broadcast %cst_5 : f32 to vector<8x32xf32>
    %8 = arith.maximumf %6, %7 : vector<8x32xf32>
    %9 = arith.truncf %8 : vector<8x32xf32> to vector<8x32xbf16>
    %c0_6 = arith.constant 0 : index
    %c0_7 = arith.constant 0 : index
    %10 = vector.load %arg4[%c0_6, %c0_7] : memref<32x32xbf16, #tpu.memory_space<vmem>>, vector<32x32xbf16>
    %cst_8 = arith.constant dense<0.000000e+00> : vector<8x32xf32>
    %11 = tpu.matmul %9, %10, %cst_8 {dimension_numbers = #tpu.dot_dimension_numbers<[1], [0], [0], [1], [0, 0, 1, 1], [], []>} : vector<8x32xbf16>, vector<32x32xbf16>, vector<8x32xf32> -> vector<8x32xf32>
    %c0_9 = arith.constant 0 : index
    %c0_10 = arith.constant 0 : index
    %12 = vector.load %arg5[%c0_9, %c0_10] : memref<1x32xf32, #tpu.memory_space<vmem>>, vector<1x32xf32>
    %13 = vector.broadcast %12 : vector<1x32xf32> to vector<8x32xf32>
    %14 = arith.addf %11, %13 : vector<8x32xf32>
    %cst_11 = arith.constant 0.000000e+00 : f32
    %15 = vector.broadcast %cst_11 : f32 to vector<8x32xf32>
    %16 = arith.maximumf %14, %15 : vector<8x32xf32>
    %17 = arith.truncf %16 : vector<8x32xf32> to vector<8x32xbf16>
    %c0_12 = arith.constant 0 : index
    %c0_13 = arith.constant 0 : index
    %18 = vector.load %arg6[%c0_12, %c0_13] : memref<32x8xbf16, #tpu.memory_space<vmem>>, vector<32x8xbf16>
    %cst_14 = arith.constant dense<0.000000e+00> : vector<8x8xf32>
    %19 = tpu.matmul %17, %18, %cst_14 {dimension_numbers = #tpu.dot_dimension_numbers<[1], [0], [0], [1], [0, 0, 1, 1], [], []>} : vector<8x32xbf16>, vector<32x8xbf16>, vector<8x8xf32> -> vector<8x8xf32>
    %c0_15 = arith.constant 0 : index
    %c0_16 = arith.constant 0 : index
    %20 = vector.load %arg7[%c0_15, %c0_16] : memref<1x8xf32, #tpu.memory_space<vmem>>, vector<1x8xf32>
    %21 = vector.broadcast %20 : vector<1x8xf32> to vector<8x8xf32>
    %22 = arith.addf %19, %21 : vector<8x8xf32>
    %23 = tpu.iota {dimensions = array<i32: 1>} : vector<8x8xi32>
    %cst_17 = arith.constant -2.000000e+01 : f32
    %cst_18 = arith.constant 2.000000e+00 : f32
    %24 = vector.broadcast %cst_17 : f32 to vector<8x8xf32>
    %25 = arith.maximumf %24, %22 : vector<8x8xf32>
    %26 = vector.broadcast %cst_18 : f32 to vector<8x8xf32>
    %27 = arith.minimumf %26, %25 : vector<8x8xf32>
    %c4_i32 = arith.constant 4 : i32
    %28 = vector.broadcast %c4_i32 : i32 to vector<8x8xi32>
    %29 = arith.cmpi sge, %23, %28 : vector<8x8xi32>
    %30 = arith.select %29, %27, %22 : vector<8x8xi1>, vector<8x8xf32>
    %c0_19 = arith.constant 0 : index
    %c0_20 = arith.constant 0 : index
    %31 = vector.load %arg8[%c0_19, %c0_20] : memref<8x8xf32, #tpu.memory_space<vmem>>, vector<8x8xf32>
    tpu.vector_store %arg8[%c0_19, %c0_20], %30 {strides = array<i32>} : memref<8x8xf32, #tpu.memory_space<vmem>>, vector<8x8xf32>,
    return
  }
  func.func @transform_0(%arg0: i32) -> (i32, i32) {
    %c0_i32 = arith.constant 0 : i32
    %c0_i32_0 = arith.constant 0 : i32
    return %arg0, %c0_i32 : i32, i32
  }
  func.func @transform_1(%arg0: i32) -> (i32, i32) {
    %c0_i32 = arith.constant 0 : i32
    %c0_i32_0 = arith.constant 0 : i32
    %c0_i32_1 = arith.constant 0 : i32
    return %c0_i32, %c0_i32_0 : i32, i32
  }
  func.func @transform_2(%arg0: i32) -> (i32, i32) {
    %c0_i32 = arith.constant 0 : i32
    %c0_i32_0 = arith.constant 0 : i32
    %c0_i32_1 = arith.constant 0 : i32
    return %c0_i32, %c0_i32_0 : i32, i32
  }
  func.func @transform_3(%arg0: i32) -> (i32, i32) {
    %c0_i32 = arith.constant 0 : i32
    %c0_i32_0 = arith.constant 0 : i32
    %c0_i32_1 = arith.constant 0 : i32
    return %c0_i32, %c0_i32_0 : i32, i32
  }
  func.func @transform_4(%arg0: i32) -> (i32, i32) {
    %c0_i32 = arith.constant 0 : i32
    %c0_i32_0 = arith.constant 0 : i32
    %c0_i32_1 = arith.constant 0 : i32
    return %c0_i32, %c0_i32_0 : i32, i32
  }
  func.func @transform_5(%arg0: i32) -> (i32, i32) {
    %c0_i32 = arith.constant 0 : i32
    %c0_i32_0 = arith.constant 0 : i32
    %c0_i32_1 = arith.constant 0 : i32
    return %c0_i32, %c0_i32_0 : i32, i32
  }
  func.func @transform_6(%arg0: i32) -> (i32, i32) {
    %c0_i32 = arith.constant 0 : i32
    %c0_i32_0 = arith.constant 0 : i32
    %c0_i32_1 = arith.constant 0 : i32
    return %c0_i32, %c0_i32_0 : i32, i32
  }
  func.func @transform_7(%arg0: i32) -> (i32, i32) {
    %c0_i32 = arith.constant 0 : i32
    %c0_i32_0 = arith.constant 0 : i32
    return %arg0, %c0_i32 : i32, i32
  }
}

</mosaic_0001>

<bundles_post_ra>
// kernel: tpu_custom_call.1
= control target key start
LH: loop header
LB: loop body
LE: loop exit
PB: predicated region body
PF: predicated region fallthrough
CT: control target
= control target key end

     0   :  { %12 = vsyncpa [#allocation3], 0  ;;  %s457_s0 = inlined_call_operand.vmem [shape: f32[8,16], index: 0, kind: input, shape index: {}]   ;;  %s458_s1 = inlined_call_operand.hbm [shape: bf16[16,32], index: 1, kind: input, shape index: {}]   ;;  %s459_s2 = inlined_call_operand.vmem [shape: f32[1,32], index: 2, kind: input, shape index: {}]   ;;  %s460_s3 = inlined_call_operand.vmem [shape: bf16[32,32], index: 3, kind: input, shape index: {}]   ;;  %s461_s4 = inlined_call_operand.vmem [shape: f32[1,32], index: 4, kind: input, shape index: {}]   ;;  %s462_s5 = inlined_call_operand.vmem [shape: bf16[32,8], index: 5, kind: input, shape index: {}]   ;;  %s463_s6 = inlined_call_operand.vmem [shape: f32[1,8], index: 6, kind: input, shape index: {}]   ;;  %s464_s7 = inlined_call_operand.hbm [shape: f32[8,8], index: 7, kind: output, shape index: {}]  }
   0x1   :  { %13 = vsyncpa [#allocation4], 0  ;;  %s363_s24 = smov [#allocation2]   ;;  %s315_s28 = scalar_lea.hbm %s458_s1, 128 }
   0x2   :  { %s21_s25 = sshll.u32 %s363_s24, 4  ;;  %p316_p0 = scmp.ne.s32.totalorder %s458_s1, %s315_s28  ;;  %s22_s25 = int_to_ptr.vmem [resolvable:$true] %s21_s25 }
   0x3   :  { %p319_p1 = scmp.lt.u32.totalorder %s315_s28, %s458_s1 }
   0x5   :  { %p321_p2 = pnand %p319_p1, %p316_p0 }
   0x7   :  { %324 = shalt.err (!%p321_p2)
}
   0x8   :  { %s325_s10 = scalar_lea.vmem %s22_s25, 128  ;;  %p330_p4 = scmp.lt.s32.totalorder %s22_s25, %s22_s25 }
   0x9   :  { %p326_p3 = scmp.ne.s32.totalorder %s22_s25, %s325_s10  ;;  %p331_p5 = scmp.lt.s32.totalorder %s325_s10, %s325_s10 }
   0xb   :  { %p332_p6 = por %p331_p5, %p330_p4 }
   0xd   :  { %p333_p7 = pnand %p332_p6, %p326_p3 }
   0xf   :  { %336 = shalt.err (!%p333_p7)
}
  0x10   :  { %s364_s11 = smov 64   ;;  %s365_s12 = smov 4  }
  0x11   :  { %27 = dma.hbm_to_vmem [thread:$0]  %s458_s1, 128, %s22_s25, [#allocation3], %s364_s11, %s364_s11, %s365_s12  }
  0x12   :  { %359 = dma.done.wait [#allocation3], 128  }
  0x13   :  { %360 = vsyncadd [#allocation3], 4294967168  ;;  %v366_v0 = vmov 0.0   ;;  %vm367_vm0 = vmmov 0   ;;  %v310_v1 = vld [vmem:[#allocation2] sm:$0xff]   ;;  %vm59_vm1 = vcmask 130048   ;;  %v240_v24 = vlaneseq }
  0x14   :  { %282 = vmatprep.subr.bf16.mxu0 %v366_v0  ;;  %284 = vmatprep.mubr.msk.bf16.mxu0 %vm367_vm0, %v366_v0  ;;  %v42_v2 = vld [vmem:[%s457_s0] sm:$0xff]  ;;  %v312_v5 = vld [vmem:[%s460_s3 + $0x8] sm:$0xff]   ;;  %vm128_vm2 = vcmask 261120   ;;  %vm246_vm4 = vcmask 64512  }
  0x15   :  { %288 = vmatprep.subr.bf16.mxu1 %v366_v0  ;;  %292 = vmatprep.mubr.msk.bf16.mxu1 %vm367_vm0, %v366_v0  ;;  %v43_v3 = vpack.c.bf16 %v42_v2, %v42_v2  ;;  %v311_v4 = vld [vmem:[%s460_s3] sm:$0xff]   ;;  %v314_v15 = vld [vmem:[%s462_s5 + $0x8] sm:$0xff]   ;;  %v241_v27 = vand.u32 127, %v240_v24 }
  0x16   :  { %283 = vmatpush3.bf16.msra.mxu0 %v310_v1  ;;  %289 = vmatpush3.bf16.msra.mxu1 %v311_v4  ;;  %v313_v6 = vld [vmem:[%s462_s5] sm:$0xff]  }
  0x17   :  { %296 = vmatprep.subr.bf16.mxu0 %v366_v0  ;;  %290 = vmatprep.subr.bf16.mxu1 %v366_v0  ;;  %v263_v7 = vld [vmem:[%s459_s2] ss:$0 sm:$0xff]  ;;  %vm244_vm3 = vcmp.ge.s32.totalorder %v241_v27, 4 }
  0x18   :  { %v266_v16 = vld [vmem:[%s461_s4] ss:$0 sm:$0xff]  ;;  %s368_s4 = smov [#allocation5]  }
  0x19   :  { %285 = vmatmul.mubr.msk.bf16.vlgmr.msra.gmra.mrb[0].mxu0 %vm59_vm1, %v43_v3  ;;  %v270_v25 = vld [vmem:[%s463_s6] ss:$0 sm:$0xff]  ;;  %s254_s5 = sshll.u32 %s368_s4, 4  ;;  %s255_s5 = int_to_ptr.vmem [resolvable:$true] %s254_s5 }
  0x1a   :  { %300 = vmatprep.mubr.msk.bf16.mxu0 %vm367_vm0, %v366_v0  ;;  %291 = vmatpush3.bf16.msra.mxu1 %v312_v5  ;;  %s337_s27 = scalar_lea.vmem %s255_s5, 128  ;;  %p342_p9 = scmp.lt.s32.totalorder %s255_s5, %s255_s5 }
  0x1b   :  { %297 = vmatpush3.bf16.msra.mxu0 %v313_v6  ;;  %p338_p8 = scmp.ne.s32.totalorder %s255_s5, %s337_s27  ;;  %p343_p10 = scmp.lt.s32.totalorder %s337_s27, %s337_s27 }
  0x1c   :  { %298 = vmatprep.subr.bf16.mxu0 %v366_v0 }
  0x1d   :  { %p344_p11 = por %p343_p10, %p342_p9 }
  0x1f   :  { %299 = vmatpush3.bf16.msra.mxu0 %v314_v15  ;;  %p345_p12 = pnand %p344_p11, %p338_p8 }
  0xec   :  { %v97_v8 = vpop.f32.mrb[0].mxu0 }
  0xed   :  { %v98_v9 = vadd.f32 %v263_v7, %v97_v8  ;;  %v286_v10 = vpop.f32.mrb[1].mxu0 }
  0xee   :  { %v100_v11 = vpop.f32.mrb[2].mxu0 }
  0xef   :  { %v103_v12 = vmax.f32 %v98_v9, 0.0  ;;  %v287_v13 = vpop.f32.mrb[3].mxu0 }
  0xf1   :  { %v104_v14 = vpack.c.bf16 %v103_v12, %v103_v12 }
  0xf3   :  { %293 = vmatmul.mubr.msk.bf16.vlgmr.msra.gmra.mrb[0].mxu1 %vm128_vm2, %v104_v14 }
 0x1c6   :  { %v166_v17 = vpop.f32.mrb[0].mxu1 }
 0x1c7   :  { %v167_v18 = vadd.f32 %v266_v16, %v166_v17  ;;  %v294_v19 = vpop.f32.mrb[1].mxu1 }
 0x1c8   :  { %v169_v20 = vpop.f32.mrb[2].mxu1 }
 0x1c9   :  { %v172_v21 = vmax.f32 %v167_v18, 0.0  ;;  %v295_v22 = vpop.f32.mrb[3].mxu1 }
 0x1cb   :  { %v173_v23 = vpack.c.bf16 %v172_v21, %v172_v21 }
 0x1cd   :  { %301 = vmatmul.mubr.msk.bf16.vlgmr.msra.gmra.mrb[4].mxu0 %vm128_vm2, %v173_v23 }
 0x2a0   :  { %v234_v26 = vpop.f32.mrb[4].mxu0 }
 0x2a1   :  { %v235_v28 = vadd.f32 %v270_v25, %v234_v26  ;;  %v302_v29 = vpop.f32.mrb[5].mxu0 }
 0x2a2   :  { %v237_v30 = vpop.f32.mrb[6].mxu0 }
 0x2a3   :  { %v242_v31 = vmax.f32 %v235_v28, -20.0  ;;  %v303_v32 = vpop.f32.mrb[7].mxu0 }
 0x2a5   :  { %v243_v33 = vmin.f32 %v242_v31, 2.0 }
 0x2a7   :  { %v245_v34 = vsel %vm244_vm3, %v243_v33, %v235_v28 }
 0x2a8   :  { %247 = vst.msk [vmem:[#allocation5] sm:$0xff] %vm246_vm4, %v245_v34 }
 0x2a9   :  { %348 = shalt.err (!%p345_p12)
}
 0x2aa   :  { %s349_s29 = scalar_lea.hbm %s464_s7, 128 }
 0x2ab   :  { %p350_p13 = scmp.ne.s32.totalorder %s464_s7, %s349_s29  ;;  %p353_p0 = scmp.lt.u32.totalorder %s349_s29, %s464_s7 }
 0x2ad   :  { %p355_p1 = pnand %p353_p0, %p350_p13 }
 0x2af   :  { %358 = shalt.err (!%p355_p1)
}
 0x2b0   :  { %257 = dma.vmem_to_hbm [thread:$0]  %s255_s5, 128, %s464_s7, [#allocation4]  }
 0x2b1   :  { %361 = dma.done.wait [#allocation4], 128  }
 0x2b2   :  { %362 = vsyncadd [#allocation4], 4294967168 }
 0x2b3   :  { %261 = vsyncpa [#allocation3], 1 }
 0x2b4   :  { %262 = vsyncpa [#allocation4], 1 }

</bundles_post_ra>
